<compile_context>
chip_gen: v7x
topology: tpu7x:2x2x1
jax: 0.10.0
libtpu: 0.0.40
codegen_flags: <defaults>
</compile_context>

<pallas_src>
import jax
import jax.numpy as jnp
from jax.experimental import pallas as pl
from jax.experimental.pallas import tpu as pltpu


def _link_pred_kernel(first_ref, second_ref, wdt_ref, wdb_ref, bd_ref, out_ref):
    # first_ref, second_ref : [H, TE]   endpoint features, edges on lanes
    # wdt_ref,  wdb_ref     : [H, 1]    fused-weight class-difference columns
    # bd_ref                : [1, 1]    fused-bias class difference
    # out_ref               : [2, TE]   row 0 = P(class 0), row 1 = P(class 1)
    #
    # Logit difference d = l0 - l1. With edges on lanes this is an elementwise
    # multiply (VPU) + sublane reduction (XLU); exp goes to the EUP. The
    # kernel is DMA-bound, so none of these units are close to saturation.
    d = (
        jnp.sum(first_ref[...] * wdt_ref[...], axis=0, keepdims=True)
        + jnp.sum(second_ref[...] * wdb_ref[...], axis=0, keepdims=True)
        + bd_ref[...]
    )                                      # [1, TE]
    p0 = 1.0 / (1.0 + jnp.exp(-d))         # softmax([l0, l1])[0] == sigmoid(l0 - l1)
    out_ref[0:1, :] = p0                   # lane-dense stores (TE multiple of 128)
    out_ref[1:2, :] = 1.0 - p0


def _link_pred_head_pallas(first_t, second_t, wd_top, wd_bot, bd, *, tile_e):
    """first_t/second_t: [H, E_pad] f32, E_pad % tile_e == 0. Returns [2, E_pad]."""
    H, E_pad = first_t.shape
    grid = (E_pad // tile_e,)

    return pl.pallas_call(
        _link_pred_kernel,
        out_shape=jax.ShapeDtypeStruct((2, E_pad), jnp.float32),
        grid_spec=pltpu.PrefetchScalarGridSpec(
            num_scalar_prefetch=0,
            grid=grid,
            in_specs=[
                pl.BlockSpec((H, tile_e), lambda i: (0, i)),   # first endpoints
                pl.BlockSpec((H, tile_e), lambda i: (0, i)),   # second endpoints
                pl.BlockSpec((H, 1), lambda i: (0, 0)),        # wd_top (resident)
                pl.BlockSpec((H, 1), lambda i: (0, 0)),        # wd_bot (resident)
                pl.BlockSpec((1, 1), lambda i: (0, 0)),        # bd     (resident)
            ],
            out_specs=pl.BlockSpec((2, tile_e), lambda i: (0, i)),
        ),
        compiler_params=pltpu.CompilerParams(
            dimension_semantics=("parallel",)),
    )(first_t, second_t, wd_top, wd_bot, bd)


def _pick_tile_e(H, E, vmem_budget_bytes=8 * 1024 * 1024):
    """Edge tile: multiple of 128, sized so 2 inputs * 2 bufs * H * TE * 4B fits
    in the budget, capped at 1024, and clamped so tiny E isn't over-padded."""
    by_budget = vmem_budget_bytes // (16 * max(H, 1))          # 4 * H * TE * 4B
    tile = max(128, min(1024, (by_budget // 128) * 128))
    e_round = max(128, pl.cdiv(E, 128) * 128)                  # don't pad past need
    return min(tile, e_round)


def link_prediction(node_features, edges, params, *, tile_e=None):
    """Full forward matching the PyTorch module.

    node_features: [N, H] float32 (post-GCN node features)
    edges:         [2, E] int32
    Returns softmax probabilities [E, 2].
    """
    node_features = node_features.astype(jnp.float32)
    _, H = node_features.shape
    E = edges.shape[1]

    if tile_e is None:
        tile_e = _pick_tile_e(H, E)
    if tile_e % 128 != 0:
        raise ValueError("tile_e must be a multiple of 128 (lane width)")
    E_pad = pl.cdiv(E, tile_e) * tile_e

    # Pad the tiny [2, E] index array (NOT the big feature matrix); padded
    # entries point at node 0 and their rows are sliced off at the end.
    edges_p = jnp.pad(edges, ((0, 0), (0, E_pad - E)))

    # Gather endpoint features with edges on the lane axis: [H, E_pad] each.
    nf_t = node_features.T                                  # [H, N] (small, one-time)
    first_t = jnp.take(nf_t, edges_p[0], axis=1)            # [H, E_pad]
    second_t = jnp.take(nf_t, edges_p[1], axis=1)           # [H, E_pad]

    # Fuse the two Linears (legal: no activation between them in the module)
    # and reduce to class-difference form for the sigmoid softmax.
    w_fused = params["w1"] @ params["w2"]                   # [2H, 2]
    b_fused = params["b1"] @ params["w2"] + params["b2"]    # [1, 2]
    wd = (w_fused[:, 0] - w_fused[:, 1]).reshape(2 * H, 1)  # [2H, 1]
    wd_top = wd[:H]                                         # [H, 1]
    wd_bot = wd[H:]                                         # [H, 1]
    bd = (b_fused[:, 0] - b_fused[:, 1]).reshape(1, 1)      # [1, 1]

    probs_t = _link_pred_head_pallas(
        first_t, second_t, wd_top, wd_bot, bd, tile_e=tile_e)  # [2, E_pad]
    return probs_t.T[:E]                                       # [E, 2]


def init_params(key, hidden_dim):
    """Deterministic synthetic init (PyTorch Linear-style uniform bounds)."""
    k1, k2, k3, k4 = jax.random.split(key, 4)
    in1, out1 = 2 * hidden_dim, 4 * hidden_dim
    in2, out2 = 4 * hidden_dim, 2
    bound1 = 1.0 / jnp.sqrt(in1)
    bound2 = 1.0 / jnp.sqrt(in2)
    return {
        # stored as [in, out] so composition is x @ W
        "w1": jax.random.uniform(k1, (in1, out1), jnp.float32, -bound1, bound1),
        "b1": jax.random.uniform(k2, (1, out1), jnp.float32, -bound1, bound1),
        "w2": jax.random.uniform(k3, (in2, out2), jnp.float32, -bound2, bound2),
        "b2": jax.random.uniform(k4, (1, out2), jnp.float32, -bound2, bound2),
    }


def _reference(node_features, edges, params):
    # Faithful two-layer reference (unfused), as in the PyTorch module.
    first = node_features[edges[0]]
    second = node_features[edges[1]]
    x = jnp.concatenate([first, second], axis=1)
    x = x @ params["w1"] + params["b1"]
    x = x @ params["w2"] + params["b2"]
    return jax.nn.softmax(x, axis=-1)


if __name__ == "__main__":
    hidden_dim = 32
    num_nodes = 16
    num_edges = 8

    key = jax.random.PRNGKey(0)
    kp, kf, ke = jax.random.split(key, 3)

    params = init_params(kp, hidden_dim)
    node_features = jax.random.normal(kf, (num_nodes, hidden_dim), jnp.float32)
    edges = jax.random.randint(ke, (2, num_edges), 0, num_nodes, jnp.int32)

    out = link_prediction(node_features, edges, params)
    out = jax.block_until_ready(out)

    ref = _reference(node_features, edges, params)
    assert out.shape == (num_edges, 2)
    assert jnp.allclose(out, ref, atol=1e-5, rtol=1e-5), "mismatch vs reference"
    assert jnp.allclose(jnp.sum(out, axis=-1), 1.0, atol=1e-5), "softmax rows must sum to 1"

    print("KERNEL_OK")
</pallas_src>

<mosaic_0001>
module attributes {stable_mosaic.version = 11 : i64} {
  func.func @_link_pred_kernel(%arg0: i32, %arg1: memref<32x128xf32, #tpu.memory_space<vmem>>, %arg2: memref<32x128xf32, #tpu.memory_space<vmem>>, %arg3: memref<32x1xf32, #tpu.memory_space<vmem>>, %arg4: memref<32x1xf32, #tpu.memory_space<vmem>>, %arg5: memref<1x1xf32, #tpu.memory_space<vmem>>, %arg6: memref<2x128xf32, #tpu.memory_space<vmem>>) attributes {dimension_semantics = [#tpu.dimension_semantics<parallel>], iteration_bounds = array<i64: 1>, scalar_prefetch = 0 : i64, scratch_operands = 0 : i64, tpu.core_type = #tpu.core_type<tc>, window_params = [{transform_indices = @transform_0, window_bounds = array<i64: 32, 128>}, {transform_indices = @transform_1, window_bounds = array<i64: 32, 128>}, {pipeline_mode = #tpu.pipeline_mode<synchronous>, transform_indices = @transform_2, window_bounds = array<i64: 32, 1>}, {pipeline_mode = #tpu.pipeline_mode<synchronous>, transform_indices = @transform_3, window_bounds = array<i64: 32, 1>}, {pipeline_mode = #tpu.pipeline_mode<synchronous>, transform_indices = @transform_4, window_bounds = array<i64: 1, 1>}, {transform_indices = @transform_5, window_bounds = array<i64: 2, 128>}]} {
    %c0 = arith.constant 0 : index
    %c0_0 = arith.constant 0 : index
    %0 = vector.load %arg1[%c0, %c0_0] : memref<32x128xf32, #tpu.memory_space<vmem>>, vector<32x128xf32>
    %c0_1 = arith.constant 0 : index
    %c0_2 = arith.constant 0 : index
    %1 = vector.load %arg3[%c0_1, %c0_2] : memref<32x1xf32, #tpu.memory_space<vmem>>, vector<32x1xf32>
    %2 = vector.broadcast %1 : vector<32x1xf32> to vector<32x128xf32>
    %3 = arith.mulf %0, %2 : vector<32x128xf32>
    %cst = arith.constant dense<0.000000e+00> : vector<128xf32>
    %4 = vector.multi_reduction <add>, %3, %cst [0] : vector<32x128xf32> to vector<128xf32>
    %5 = vector.shape_cast %4 : vector<128xf32> to vector<1x128xf32>
    %c0_3 = arith.constant 0 : index
    %c0_4 = arith.constant 0 : index
    %6 = vector.load %arg2[%c0_3, %c0_4] : memref<32x128xf32, #tpu.memory_space<vmem>>, vector<32x128xf32>
    %c0_5 = arith.constant 0 : index
    %c0_6 = arith.constant 0 : index
    %7 = vector.load %arg4[%c0_5, %c0_6] : memref<32x1xf32, #tpu.memory_space<vmem>>, vector<32x1xf32>
    %8 = vector.broadcast %7 : vector<32x1xf32> to vector<32x128xf32>
    %9 = arith.mulf %6, %8 : vector<32x128xf32>
    %cst_7 = arith.constant dense<0.000000e+00> : vector<128xf32>
    %10 = vector.multi_reduction <add>, %9, %cst_7 [0] : vector<32x128xf32> to vector<128xf32>
    %11 = vector.shape_cast %10 : vector<128xf32> to vector<1x128xf32>
    %12 = arith.addf %5, %11 : vector<1x128xf32>
    %c0_8 = arith.constant 0 : index
    %c0_9 = arith.constant 0 : index
    %13 = vector.load %arg5[%c0_8, %c0_9] : memref<1x1xf32, #tpu.memory_space<vmem>>, vector<1x1xf32>
    %14 = vector.broadcast %13 : vector<1x1xf32> to vector<1x128xf32>
    %15 = arith.addf %12, %14 : vector<1x128xf32>
    %cst_10 = arith.constant 0.000000e+00 : f32
    %16 = vector.broadcast %cst_10 : f32 to vector<1x128xf32>
    %17 = arith.subf %16, %15 : vector<1x128xf32>
    %18 = math.exp %17 : vector<1x128xf32>
    %cst_11 = arith.constant 1.000000e+00 : f32
    %19 = vector.broadcast %cst_11 : f32 to vector<1x128xf32>
    %20 = arith.addf %19, %18 : vector<1x128xf32>
    %cst_12 = arith.constant 1.000000e+00 : f32
    %21 = vector.broadcast %cst_12 : f32 to vector<1x128xf32>
    %22 = arith.divf %21, %20 : vector<1x128xf32>
    %c0_13 = arith.constant 0 : index
    %c0_14 = arith.constant 0 : index
    %23 = vector.load %arg6[%c0_13, %c0_14] : memref<2x128xf32, #tpu.memory_space<vmem>>, vector<1x128xf32>
    tpu.vector_store %arg6[%c0_13, %c0_14], %22 {strides = array<i32>} : memref<2x128xf32, #tpu.memory_space<vmem>>, vector<1x128xf32>,
    %cst_15 = arith.constant 1.000000e+00 : f32
    %24 = vector.broadcast %cst_15 : f32 to vector<1x128xf32>
    %25 = arith.subf %24, %22 : vector<1x128xf32>
    %c1 = arith.constant 1 : index
    %c0_16 = arith.constant 0 : index
    %26 = vector.load %arg6[%c1, %c0_16] : memref<2x128xf32, #tpu.memory_space<vmem>>, vector<1x128xf32>
    tpu.vector_store %arg6[%c1, %c0_16], %25 {strides = array<i32>} : memref<2x128xf32, #tpu.memory_space<vmem>>, vector<1x128xf32>,
    return
  }
  func.func @transform_0(%arg0: i32) -> (i32, i32) {
    %c0_i32 = arith.constant 0 : i32
    %c0_i32_0 = arith.constant 0 : i32
    return %c0_i32, %arg0 : i32, i32
  }
  func.func @transform_1(%arg0: i32) -> (i32, i32) {
    %c0_i32 = arith.constant 0 : i32
    %c0_i32_0 = arith.constant 0 : i32
    return %c0_i32, %arg0 : i32, i32
  }
  func.func @transform_2(%arg0: i32) -> (i32, i32) {
    %c0_i32 = arith.constant 0 : i32
    %c0_i32_0 = arith.constant 0 : i32
    %c0_i32_1 = arith.constant 0 : i32
    return %c0_i32, %c0_i32_0 : i32, i32
  }
  func.func @transform_3(%arg0: i32) -> (i32, i32) {
    %c0_i32 = arith.constant 0 : i32
    %c0_i32_0 = arith.constant 0 : i32
    %c0_i32_1 = arith.constant 0 : i32
    return %c0_i32, %c0_i32_0 : i32, i32
  }
  func.func @transform_4(%arg0: i32) -> (i32, i32) {
    %c0_i32 = arith.constant 0 : i32
    %c0_i32_0 = arith.constant 0 : i32
    %c0_i32_1 = arith.constant 0 : i32
    return %c0_i32, %c0_i32_0 : i32, i32
  }
  func.func @transform_5(%arg0: i32) -> (i32, i32) {
    %c0_i32 = arith.constant 0 : i32
    %c0_i32_0 = arith.constant 0 : i32
    return %c0_i32, %arg0 : i32, i32
  }
}

</mosaic_0001>

<bundles_post_ra>
// kernel: tpu_custom_call.1
= control target key start
LH: loop header
LB: loop body
LE: loop exit
PB: predicated region body
PF: predicated region fallthrough
CT: control target
= control target key end

     0   :  { %s267_s0 = inlined_call_operand.vmem [shape: f32[32,128], index: 0, kind: input, shape index: {}]   ;;  %s268_s1 = inlined_call_operand.vmem [shape: f32[32,128], index: 1, kind: input, shape index: {}]   ;;  %s269_s2 = inlined_call_operand.vmem [shape: f32[32,1], index: 2, kind: input, shape index: {}]   ;;  %s270_s3 = inlined_call_operand.vmem [shape: f32[32,1], index: 3, kind: input, shape index: {}]   ;;  %s271_s4 = inlined_call_operand.<no memory space> [shape: f32[1,1], index: 4, kind: input, shape index: {}]   ;;  %s272_s5 = inlined_call_operand.hbm [shape: f32[2,128], index: 5, kind: output, shape index: {}]  }
   0x1   :  { %v10_v0 = vstv %s271_s4 }
   0x2   :  { %11 = vst [vmem:[#allocation2] sm:$0x1] %v10_v0 }
   0x3   :  { %v68_v1 = vld [vmem:[%s270_s3] sm:$0xff]  ;;  %v172_v3 = vmov 0   ;;  %v69_v4 = vld [vmem:[%s270_s3 + $0x8] sm:$0xff] }
   0x4   :  { %v27_v2 = vld [vmem:[%s269_s2] sm:$0xff]  ;;  %143 = vset.pattern.permute.xlu1 %v172_v3  ;;  %142 = vset.pattern.permute.xlu0 %v172_v3  ;;  %v28_v5 = vld [vmem:[%s269_s2 + $0x8] sm:$0xff] }
   0x5   :  { %74 = vperm.xlu1 %143, %v68_v1   ;;  %33 = vperm.xlu0 %142, %v27_v2  }
   0x6   :  { %12 = vsyncpa [#allocation4], 0  ;;  %v70_v6 = vld [vmem:[%s270_s3 + $0x10] sm:$0xff]  ;;  %v71_v8 = vld [vmem:[%s270_s3 + $0x18] sm:$0xff]  ;;  %v112_v43 = vlaneseq }
   0x7   :  { %v29_v7 = vld [vmem:[%s269_s2 + $0x10] sm:$0xff]  ;;  %v30_v9 = vld [vmem:[%s269_s2 + $0x18] sm:$0xff]  ;;  %v65_v13 = vld [vmem:[%s268_s1 + $0x8] sm:$0xff] }
   0x8   :  { %v24_v16 = vld [vmem:[%s267_s0 + $0x8] sm:$0xff]  ;;  %v64_v17 = vld [vmem:[%s268_s1] sm:$0xff]  ;;  %v66_v19 = vld [vmem:[%s268_s1 + $0x10] sm:$0xff]  ;;  %v113_v48 = vshrl.u32 %v112_v43, 7 }
   0x9   :  { %79 = vperm.xlu1 %143, %v69_v4   ;;  %38 = vperm.xlu0 %142, %v28_v5   ;;  %v106_v10 = vld [vmem:[#allocation2] sm:$0x1]  ;;  %v25_v20 = vld [vmem:[%s267_s0 + $0x10] sm:$0xff]  ;;  %v67_v29 = vld [vmem:[%s268_s1 + $0x18] sm:$0xff] }
   0xa   :  { %v23_v18 = vld [vmem:[%s267_s0] sm:$0xff]  ;;  %v26_v30 = vld [vmem:[%s267_s0 + $0x18] sm:$0xff]  ;;  %v114_v52 = vsub.s32 0, %v113_v48  ;;  %s173_s0 = smov [#allocation3]  }
   0xb   :  { %s132_s1 = sshll.u32 %s173_s0, 4  ;;  %s133_s1 = int_to_ptr.vmem [resolvable:$true] %s132_s1 }
   0xc   :  { %s148_s24 = scalar_lea.vmem %s133_s1, 32  ;;  %p153_p1 = scmp.lt.s32.totalorder %s133_s1, %s133_s1 }
   0xd   :  { %84 = vperm.xlu1 %143, %v70_v6   ;;  %43 = vperm.xlu0 %142, %v29_v7   ;;  %p149_p0 = scmp.ne.s32.totalorder %s133_s1, %s148_s24  ;;  %p154_p2 = scmp.lt.s32.totalorder %s148_s24, %s148_s24 }
   0xf   :  { %p155_p3 = por %p154_p2, %p153_p1 }
  0x11   :  { %89 = vperm.xlu1 %143, %v71_v8   ;;  %48 = vperm.xlu0 %142, %v30_v9   ;;  %p156_p4 = pnand %p155_p3, %p149_p0 }
  0x15   :  { %109 = vperm.xlu0 %142, %v106_v10  }
  0x84   :  { %v75_v11 = vpop.permute.xlu1 %74  ;;  %v34_v12 = vpop.permute.xlu0 %33 }
  0x85   :  { %v92_v25 = vmul.f32 %v75_v11, %v64_v17  ;;  %v51_v26 = vmul.f32 %v34_v12, %v23_v18 }
  0x88   :  { %v80_v14 = vpop.permute.xlu1 %79  ;;  %v39_v15 = vpop.permute.xlu0 %38 }
  0x89   :  { %v93_v21 = vmul.f32 %v80_v14, %v65_v13  ;;  %v52_v22 = vmul.f32 %v39_v15, %v24_v16 }
  0x8b   :  { %v96_v31 = vadd.f32 %v93_v21, %v92_v25  ;;  %v55_v32 = vadd.f32 %v52_v22, %v51_v26 }
  0x8c   :  { %v85_v23 = vpop.permute.xlu1 %84  ;;  %v44_v24 = vpop.permute.xlu0 %43 }
  0x8d   :  { %v94_v27 = vmul.f32 %v85_v23, %v66_v19  ;;  %v53_v28 = vmul.f32 %v44_v24, %v25_v20 }
  0x8f   :  { %v97_v35 = vadd.f32 %v96_v31, %v94_v27  ;;  %v56_v36 = vadd.f32 %v55_v32, %v53_v28 }
  0x90   :  { %v90_v33 = vpop.permute.xlu1 %89  ;;  %v49_v34 = vpop.permute.xlu0 %48 }
  0x91   :  { %v95_v37 = vmul.f32 %v90_v33, %v67_v29  ;;  %v54_v38 = vmul.f32 %v49_v34, %v26_v30 }
  0x93   :  { %v98_v39 = vadd.f32 %v97_v35, %v95_v37  ;;  %v57_v40 = vadd.f32 %v56_v36, %v54_v38 }
  0x94   :  { %v110_v54 = vpop.permute.xlu0 %109 }
  0x95   :  { %v99_v41 = vrot.slane %v98_v39, 4  ;;  %v58_v42 = vrot.slane %v57_v40, 4  ;;  %v115_v58 = vrot.slane %v110_v54, %v114_v52 }
  0x97   :  { %v100_v44 = vadd.f32 %v99_v41, %v98_v39  ;;  %v59_v45 = vadd.f32 %v58_v42, %v57_v40 }
  0x99   :  { %v101_v46 = vrot.slane %v100_v44, 2  ;;  %v60_v47 = vrot.slane %v59_v45, 2 }
  0x9b   :  { %v102_v49 = vadd.f32 %v101_v46, %v100_v44  ;;  %v61_v50 = vadd.f32 %v60_v47, %v59_v45 }
  0x9d   :  { %v103_v51 = vrot.slane %v102_v49, 1  ;;  %v62_v53 = vrot.slane %v61_v50, 1 }
  0x9f   :  { %v104_v55 = vadd.f32 %v103_v51, %v102_v49  ;;  %v63_v56 = vadd.f32 %v62_v53, %v61_v50 }
  0xa1   :  { %v105_v57 = vadd.f32 %v104_v55, %v63_v56 }
  0xa3   :  { %v116_v59 = vadd.f32 %v115_v58, %v105_v57 }
  0xa5   :  { %v117_v60 = vsub.f32 0.0, %v116_v59 }
  0xa7   :  { %v118_v61 = vmul.f32 1.442695, %v117_v60 }
  0xa9   :  { %144 = vpow2.f32 %v118_v61 }
  0xb3   :  { %v145_v62 = vpop.eup %144 }
  0xb4   :  { %v120_v63 = vadd.f32 1.0, %v145_v62 }
  0xb6   :  { %146 = vrcp.f32 %v120_v63 }
  0xc0   :  { %v147_v0 = vpop.eup %146 }
  0xc1   :  { %123 = vst [vmem:[#allocation3] sm:$0x1] %v147_v0  ;;  %v124_v1 = vsub.f32 1.0, %v147_v0 }
  0xc3   :  { %125 = vst [vmem:[#allocation3 + $0x1] sm:$0x1] %v124_v1 }
  0xc4   :  { %159 = shalt.err (!%p156_p4)
}
  0xc5   :  { %s160_s4 = scalar_lea.hbm %s272_s5, 32 }
  0xc6   :  { %p161_p5 = scmp.ne.s32.totalorder %s272_s5, %s160_s4  ;;  %p164_p6 = scmp.lt.u32.totalorder %s160_s4, %s272_s5 }
  0xc8   :  { %p166_p7 = pnand %p164_p6, %p161_p5 }
  0xca   :  { %169 = shalt.err (!%p166_p7)
}
  0xcb   :  { %135 = dma.vmem_to_hbm [thread:$0]  %s133_s1, 32, %s272_s5, [#allocation4]  }
  0xcc   :  { %170 = dma.done.wait [#allocation4], 32  }
  0xcd   :  { %171 = vsyncadd [#allocation4], 4294967264 }
  0xce   :  { %139 = vsyncpa [#allocation4], 1 }

</bundles_post_ra>
